<compile_context>
chip_gen: v5e
topology: v5e:2x2
jax: 0.10.0
libtpu: 0.0.40
codegen_flags: <defaults>
</compile_context>

<pallas_src>
import jax
import jax.numpy as jnp
from jax.experimental import pallas as pl
from jax.experimental.pallas import tpu as pltpu

_LANE_CHOICES = (2048, 1024, 512, 256, 128)   # lane-dense last-dim candidates
_FALLBACK_LANES = 512                         # used only when padding is unavoidable
_TARGET_BLOCK_BYTES = 4 * 1024 * 1024         # ~4 MiB (f32-equivalent) per block
_SMALL_BYPASS_ELEMS = 64 * 1024               # below this, plain XLA fusion wins


def _round_up(a: int, b: int) -> int:
    return -(-a // b) * b


def _dispact_kernel(x_ref, o_ref):
    # Compute in f32 (kernel is memory-bound), numerically stable softplus:
    #   softplus(x) = max(x, 0) + log1p(exp(-|x|))
    x = x_ref[...].astype(jnp.float32)
    sp = jnp.maximum(x, 0.0) + jnp.log1p(jnp.exp(-jnp.abs(x)))
    o_ref[...] = jnp.clip(sp, 1e-4, 1e4).astype(o_ref.dtype)


def _dispact_ref(x: jax.Array) -> jax.Array:
    """Plain-JAX reference / small-tensor bypass path."""
    return jnp.clip(jax.nn.softplus(x.astype(jnp.float32)), 1e-4, 1e4).astype(x.dtype)


def dispact(x: jax.Array, *, small_bypass_elems: int = _SMALL_BYPASS_ELEMS) -> jax.Array:
    """Elementwise DispAct on any tensor via a tiled, lane-dense Pallas TPU kernel."""
    orig_shape = x.shape
    orig_dtype = x.dtype
    n = int(x.size)

    if n == 0:
        return x
    # Small-tensor bypass: pallas_call dispatch overhead would dominate.
    if n < small_bypass_elems:
        return _dispact_ref(x)

    itemsize = jnp.dtype(orig_dtype).itemsize
    # Sublane packing multiple: 8 (f32), 16 (bf16/f16), 32 (int8/fp8).
    sub = 8 * max(1, 4 // max(1, itemsize))

    # Pick the widest lane count that divides n AND yields at least `sub` rows,
    # so no padding copies are needed and sublane tiles are full.
    lanes = None
    for cand in _LANE_CHOICES:
        if n % cand == 0 and n // cand >= sub:
            lanes = cand
            break
    needs_pad = lanes is None
    if needs_pad:
        # n % 128 != 0 (or tiny forced-kernel input): pad flat length once.
        lanes = _FALLBACK_LANES
        rows = _round_up(-(-n // lanes), sub)
    else:
        rows = n // lanes

    # Block rows: cap at ~4 MiB f32-equivalent; aim for >= 2 grid steps so the
    # "parallel" axis can be split across both TensorCores on v7x.
    max_rows = max(sub, (_TARGET_BLOCK_BYTES // (lanes * 4)) // sub * sub)
    tm = max(sub, min(max_rows, _round_up(-(-rows // 2), sub)))
    grid = (pl.cdiv(rows, tm),)   # ragged last block handled by Pallas

    x_flat = x.reshape(-1)
    if needs_pad:
        x_flat = jnp.pad(x_flat, (0, rows * lanes - n))
    x2d = x_flat.reshape(rows, lanes)

    out = pl.pallas_call(
        _dispact_kernel,
        out_shape=jax.ShapeDtypeStruct((rows, lanes), orig_dtype),
        grid=grid,
        in_specs=[pl.BlockSpec((tm, lanes), lambda i: (i, 0))],
        out_specs=pl.BlockSpec((tm, lanes), lambda i: (i, 0)),
        compiler_params=pltpu.CompilerParams(
            dimension_semantics=("parallel",),
            # 2 bufs x (in + out) x <=4 MiB = <=16 MiB; raise v5e's 16 MiB scoped
            # default while staying well inside v6e/v7x budgets.
            vmem_limit_bytes=32 * 1024 * 1024,
        ),
        cost_estimate=pl.CostEstimate(
            flops=7 * n,
            transcendentals=2 * n,
            bytes_accessed=2 * n * itemsize,
        ),
    )(x2d)

    out_flat = out.reshape(-1)
    if needs_pad:
        out_flat = out_flat[:n]
    return out_flat.reshape(orig_shape)


if __name__ == "__main__":
    key = jax.random.PRNGKey(0)
    k1, k2, k3 = jax.random.split(key, 3)

    # 1) Module-scale NCHW input: takes the small-tensor bypass.
    x_small = jax.random.normal(k1, (2, 4, 16, 16), dtype=jnp.float32) * 5.0
    y_small = dispact(x_small)
    # 2) Same input forced through the Pallas kernel (no-pad, exact-divisor path).
    y_small_k = dispact(x_small, small_bypass_elems=0)
    # 3) n % 128 != 0: exercises the padded-fallback path + ragged grid.
    x_odd = jax.random.normal(k2, (2, 4, 30, 30), dtype=jnp.float32) * 5.0
    y_odd = dispact(x_odd, small_bypass_elems=0)
    # 4) Larger activation: natural kernel path, multi-step parallel grid.
    x_big = jax.random.normal(k3, (2, 8, 64, 64), dtype=jnp.float32) * 5.0
    y_big = dispact(x_big)
    # 5) bf16 input through the kernel (16-row sublane packing, native-dtype I/O).
    x_bf16 = x_small.astype(jnp.bfloat16)
    y_bf16 = dispact(x_bf16, small_bypass_elems=0)

    jax.block_until_ready((y_small, y_small_k, y_odd, y_big, y_bf16))

    for y, x in ((y_small, x_small), (y_small_k, x_small), (y_odd, x_odd), (y_big, x_big)):
        ref = _dispact_ref(x)
        assert y.shape == x.shape and y.dtype == x.dtype
        assert jnp.allclose(y, ref, atol=1e-5, rtol=1e-5), "mismatch vs reference"

    ref_bf16 = _dispact_ref(x_bf16)
    assert y_bf16.shape == x_bf16.shape and y_bf16.dtype == jnp.bfloat16
    assert jnp.allclose(y_bf16.astype(jnp.float32), ref_bf16.astype(jnp.float32),
                        atol=2e-2, rtol=2e-2), "bf16 mismatch vs reference"

    print("KERNEL_OK")
</pallas_src>

<mosaic_0001>
module attributes {stable_mosaic.version = 11 : i64} {
  func.func @_dispact_kernel(%arg0: i32, %arg1: memref<8x256xf32, #tpu.memory_space<vmem>>, %arg2: memref<8x256xf32, #tpu.memory_space<vmem>>) attributes {dimension_semantics = [#tpu.dimension_semantics<parallel>], iteration_bounds = array<i64: 1>, scalar_prefetch = 0 : i64, scratch_operands = 0 : i64, tpu.core_type = #tpu.core_type<tc>, window_params = [{transform_indices = @transform_0, window_bounds = array<i64: 8, 256>}, {transform_indices = @transform_1, window_bounds = array<i64: 8, 256>}]} {
    %c0 = arith.constant 0 : index
    %c0_0 = arith.constant 0 : index
    %0 = vector.load %arg1[%c0, %c0_0] : memref<8x256xf32, #tpu.memory_space<vmem>>, vector<8x256xf32>
    %cst = arith.constant 0.000000e+00 : f32
    %1 = vector.broadcast %cst : f32 to vector<8x256xf32>
    %2 = arith.maximumf %0, %1 : vector<8x256xf32>
    %3 = math.absf %0 : vector<8x256xf32>
    %cst_1 = arith.constant 0.000000e+00 : f32
    %4 = vector.broadcast %cst_1 : f32 to vector<8x256xf32>
    %5 = arith.subf %4, %3 : vector<8x256xf32>
    %6 = math.exp %5 : vector<8x256xf32>
    %7 = math.log1p %6 : vector<8x256xf32>
    %8 = arith.addf %2, %7 : vector<8x256xf32>
    %cst_2 = arith.constant 9.99999974E-5 : f32
    %cst_3 = arith.constant 1.000000e+04 : f32
    %9 = vector.broadcast %cst_2 : f32 to vector<8x256xf32>
    %10 = arith.maximumf %9, %8 : vector<8x256xf32>
    %11 = vector.broadcast %cst_3 : f32 to vector<8x256xf32>
    %12 = arith.minimumf %11, %10 : vector<8x256xf32>
    %c0_4 = arith.constant 0 : index
    %c0_5 = arith.constant 0 : index
    %13 = vector.load %arg2[%c0_4, %c0_5] : memref<8x256xf32, #tpu.memory_space<vmem>>, vector<8x256xf32>
    tpu.vector_store %arg2[%c0_4, %c0_5], %12 {strides = array<i32>} : memref<8x256xf32, #tpu.memory_space<vmem>>, vector<8x256xf32>,
    return
  }
  func.func @transform_0(%arg0: i32) -> (i32, i32) {
    %c0_i32 = arith.constant 0 : i32
    %c0_i32_0 = arith.constant 0 : i32
    return %arg0, %c0_i32 : i32, i32
  }
  func.func @transform_1(%arg0: i32) -> (i32, i32) {
    %c0_i32 = arith.constant 0 : i32
    %c0_i32_0 = arith.constant 0 : i32
    return %arg0, %c0_i32 : i32, i32
  }
}

</mosaic_0001>

<bundles_post_ra>
// kernel: tpu_custom_call.1
= control target key start
LH: loop header
LB: loop body
LE: loop exit
PB: predicated region body
PF: predicated region fallthrough
CT: control target
= control target key end

     0   :  { %6 = vsyncpa [#allocation3], 0  ;;  %s158_s0 = inlined_call_operand.hbm [shape: f32[8,256], index: 0, kind: input, shape index: {}]   ;;  %s159_s1 = inlined_call_operand.hbm [shape: f32[8,256], index: 1, kind: output, shape index: {}]  }
   0x1   :  { %7 = vsyncpa [#allocation4], 0  ;;  %s13_s8 = sshll.u32 %s158_s0, 4  ;;  %s140_s9 = smov [#allocation2]   ;;  %s14_s8 = int_to_ptr.hbm [resolvable:$true] %s13_s8 }
   0x2   :  { %s15_s10 = sshll.u32 %s140_s9, 4  ;;  %s16_s10 = int_to_ptr.vmem [resolvable:$true] %s15_s10 }
   0x3   :  { %18 = dma.hbm_to_vmem [thread:$0]  %s14_s8, 256, %s16_s10, [#allocation3]  }
   0x4   :  { %136 = dma.done.wait [#allocation3], 256  }
   0x5   :  { %137 = vsyncadd [#allocation3], 4294967040  ;;  %v23_v0 = vld [vmem:[#allocation2] sm:$0xff]  ;;  %v24_v1 = vld [vmem:[#allocation2 + $0x8] sm:$0xff]  ;;  %s141_s0 = smov [#allocation5]   ;;  %s68_s14 = sshll.u32 %s159_s1, 4  ;;  %s69_s14 = int_to_ptr.hbm [resolvable:$true] %s68_s14 }
   0x6   :  { %v27_v2 = vand.u32 2147483647, %v23_v0  ;;  %v28_v3 = vand.u32 2147483647, %v24_v1  ;;  %v25_v20 = vmax.f32 %v23_v0, 0.0  ;;  %v26_v24 = vmax.f32 %v24_v1, 0.0 }
   0x7   :  { %s66_s11 = sshll.u32 %s141_s0, 4  ;;  %s67_s11 = int_to_ptr.vmem [resolvable:$true] %s66_s11 }
   0x8   :  { %v29_v4 = vsub.f32 0.0, %v27_v2  ;;  %v30_v5 = vsub.f32 0.0, %v28_v3 }
   0xa   :  { %v31_v6 = vmul.f32 1.442695, %v29_v4  ;;  %v33_v7 = vmul.f32 1.442695, %v30_v5 }
   0xc   :  { %80 = vpow2.f32 %v31_v6 }
   0xd   :  { %82 = vpow2.f32 %v33_v7 }
  0x12   :  { %v81_v8 = vpop.eup %80 }
  0x13   :  { %v83_v9 = vpop.eup %82  ;;  %v35_v10 = vadd.f32 1.0, %v81_v8  ;;  %v38_v11 = vmul.f32 -0.5, %v81_v8  ;;  %v41_v15 = vand.u32 2147483647, %v81_v8 }
  0x14   :  { %v44_v12 = vadd.f32 1.0, %v83_v9  ;;  %v47_v13 = vmul.f32 -0.5, %v83_v9  ;;  %v50_v17 = vand.u32 2147483647, %v83_v9 }
  0x15   :  { %84 = vlog2.f32 %v35_v10  ;;  %v39_v14 = vadd.f32 1.0, %v38_v11  ;;  %vm42_vm0 = vcmp.lt.f32.partialorder %v41_v15, 0.0004427343 }
  0x16   :  { %86 = vlog2.f32 %v44_v12  ;;  %v48_v16 = vadd.f32 1.0, %v47_v13  ;;  %vm51_vm1 = vcmp.lt.f32.partialorder %v50_v17, 0.0004427343 }
  0x17   :  { %v40_v18 = vmul.f32 %v81_v8, %v39_v14 }
  0x18   :  { %v49_v21 = vmul.f32 %v83_v9, %v48_v16 }
  0x1b   :  { %v85_v19 = vpop.eup %84 }
  0x1c   :  { %v87_v22 = vpop.eup %86  ;;  %v37_v23 = vmul.f32 0.6931472, %v85_v19 }
  0x1d   :  { %v46_v25 = vmul.f32 0.6931472, %v87_v22 }
  0x1e   :  { %v43_v26 = vsel %vm42_vm0, %v40_v18, %v37_v23 }
  0x1f   :  { %v53_v27 = vadd.f32 %v43_v26, %v25_v20  ;;  %v52_v28 = vsel %vm51_vm1, %v49_v21, %v46_v25 }
  0x20   :  { %v54_v29 = vadd.f32 %v52_v28, %v26_v24 }
  0x21   :  { %v55_v30 = vmax.f32 %v53_v27, 0.0001 }
  0x22   :  { %v56_v31 = vmax.f32 %v54_v29, 0.0001 }
  0x23   :  { %v57_v32 = vmin.f32 %v55_v30, 10000.0 }
  0x24   :  { %v58_v33 = vmin.f32 %v56_v31, 10000.0 }
  0x25   :  { %59 = vst [vmem:[#allocation5] sm:$0xff] %v57_v32 }
  0x26   :  { %60 = vst [vmem:[#allocation5 + $0x8] sm:$0xff] %v58_v33 }
  0x27   :  { %71 = dma.vmem_to_hbm [thread:$0]  %s67_s11, 256, %s69_s14, [#allocation4]  }
  0x28   :  { %138 = dma.done.wait [#allocation4], 256  }
  0x29   :  { %139 = vsyncadd [#allocation4], 4294967040 }
  0x2a   :  { %76 = vsyncpa [#allocation3], 1 }
  0x2b   :  { %77 = vsyncpa [#allocation4], 1 }

</bundles_post_ra>
